<compile_context>
chip_gen: v6e
topology: v6e:2x2x1
jax: 0.10.0
libtpu: 0.0.40
codegen_flags: <defaults>
</compile_context>

<pallas_src>
import jax
import jax.numpy as jnp
from jax.experimental import pallas as pl
from jax.experimental.pallas import tpu as pltpu


# ---------------------------------------------------------------------------
# Zero-cost path: this IS Identity.forward.
# ---------------------------------------------------------------------------
def identity(x: jax.Array) -> jax.Array:
    """True identity: free, no kernel launch (preferred in real code)."""
    return x


# ---------------------------------------------------------------------------
# Pallas copy kernel: N concurrent HBM->HBM DMAs over contiguous row slices.
# ---------------------------------------------------------------------------
def _make_identity_copy_kernel(row_chunks):
    """row_chunks: tuple of static (start_row, num_rows) slices along axis 0."""
    whole_array = len(row_chunks) == 1

    def kernel(x_hbm_ref, o_hbm_ref, copy_sems):
        copies = []
        # Start every DMA first (parallel DMA queues), then wait on all.
        for i, (start, size) in enumerate(row_chunks):
            if whole_array:
                src, dst = x_hbm_ref, o_hbm_ref
            else:
                src = x_hbm_ref.at[pl.ds(start, size)]
                dst = o_hbm_ref.at[pl.ds(start, size)]
            cp = pltpu.make_async_copy(src, dst, copy_sems.at[i])
            cp.start()
            copies.append(cp)
        for cp in copies:
            cp.wait()

    return kernel


# Thresholds (host-side, static).
_SMALL_BYTES = 1 << 20    # below this the custom-call overhead dominates
_CHUNK_BYTES = 32 << 20   # above this, split into multiple concurrent DMAs
_MAX_CHUNKS = 8


def identity_pallas(
    x: jax.Array,
    *,
    donate: bool = False,
    force_kernel: bool = False,
    chunks: int | None = None,
) -> jax.Array:
    """Identity forward pass.

    By default small inputs (and 0-d / empty / donated inputs) are returned
    as-is — the exact semantics of the PyTorch module and the fastest
    possible implementation.  Larger inputs (or `force_kernel=True`) are
    materialized into a fresh buffer via grid-less HBM->HBM DMA(s).
    """
    nbytes = x.size * x.dtype.itemsize

    if donate:
        # Donating the input to the output of an identity makes the aliased
        # copy a buffer-onto-itself no-op; skip the custom call entirely.
        return identity(x)
    if x.size == 0 or x.ndim == 0:
        return identity(x)
    if nbytes < _SMALL_BYTES and not force_kernel:
        # Plain XLA handles (or elides) this better than a custom call.
        return identity(x)

    # ---- decide how many concurrent DMAs to issue (static, host-side) ----
    if chunks is None:
        if nbytes >= _CHUNK_BYTES:
            chunks = min(_MAX_CHUNKS, -(-nbytes // _CHUNK_BYTES))
        else:
            chunks = 1
    rows = x.shape[0]
    num_chunks = max(1, min(int(chunks), rows, _MAX_CHUNKS))

    base, rem = divmod(rows, num_chunks)
    row_chunks = []
    start = 0
    for i in range(num_chunks):
        size = base + (1 if i < rem else 0)
        if size == 0:
            continue
        row_chunks.append((start, size))
        start += size
    num_dmas = len(row_chunks)

    kernel = _make_identity_copy_kernel(tuple(row_chunks))

    return pl.pallas_call(
        kernel,
        out_shape=jax.ShapeDtypeStruct(x.shape, x.dtype),
        in_specs=[pl.BlockSpec(memory_space=pl.ANY)],   # input stays in HBM
        out_specs=pl.BlockSpec(memory_space=pl.ANY),    # output stays in HBM
        scratch_shapes=[pltpu.SemaphoreType.DMA((num_dmas,))],
        cost_estimate=pl.CostEstimate(
            flops=0, transcendentals=0, bytes_accessed=2 * nbytes),
    )(x)


if __name__ == "__main__":
    key = jax.random.PRNGKey(0)
    # Small NCHW-style input consistent with typical module usage.
    x = jax.random.normal(key, (2, 4, 16, 16), dtype=jnp.float32)

    # Real-code path: free, no kernel launch (this IS Identity.forward).
    assert identity(x) is x

    # Kernel path 1: single whole-array HBM->HBM DMA (forced — the input is
    # small, so the default dispatcher would bypass the custom call).
    y = jax.block_until_ready(identity_pallas(x, force_kernel=True))
    assert y.shape == x.shape, f"shape mismatch: {y.shape} vs {x.shape}"
    assert y.dtype == x.dtype, f"dtype mismatch: {y.dtype} vs {x.dtype}"
    assert bool(jnp.array_equal(y, x)), "identity output does not match input"

    # Kernel path 2: chunked multi-DMA copy (the v7x large-array path),
    # exercised at a small size by forcing 4 chunks along the leading axis.
    x2 = jax.random.normal(jax.random.PRNGKey(0), (512, 256), dtype=jnp.float32)
    y2 = jax.block_until_ready(identity_pallas(x2, force_kernel=True, chunks=4))
    assert y2.shape == x2.shape and y2.dtype == x2.dtype
    assert bool(jnp.array_equal(y2, x2)), "chunked identity mismatch"

    # Default dispatch: small inputs never touch the custom call.
    z = identity_pallas(x)
    assert z is x

    # Donation path is a pure no-op (no HBM traffic at all).
    assert identity_pallas(x, donate=True) is x

    print("KERNEL_OK")
</pallas_src>

<mosaic_0001>
module attributes {stable_mosaic.version = 11 : i64} {
  func.func @kernel(%arg0: memref<2x4x16x16xf32, #tpu.memory_space<any>>, %arg1: memref<2x4x16x16xf32, #tpu.memory_space<any>>, %arg2: memref<1x!tpu.dma_semaphore, #tpu.memory_space<semaphore_mem>>) attributes {dimension_semantics = [], scalar_prefetch = 0 : i64, scratch_operands = 1 : i64, tpu.core_type = #tpu.core_type<tc>} {
    %c0_i32 = arith.constant 0 : i32
    %0 = tpu.memref_slice %arg2[%c0_i32] : memref<1x!tpu.dma_semaphore, #tpu.memory_space<semaphore_mem>> -> memref<1x!tpu.dma_semaphore, #tpu.memory_space<semaphore_mem>>
    %1 = tpu.memref_squeeze %0 : memref<1x!tpu.dma_semaphore, #tpu.memory_space<semaphore_mem>> -> memref<!tpu.dma_semaphore, #tpu.memory_space<semaphore_mem>>
    tpu.enqueue_dma source(%arg0 : memref<2x4x16x16xf32, #tpu.memory_space<any>>) target(%arg1 : memref<2x4x16x16xf32, #tpu.memory_space<any>>) target_semaphore(%1 : memref<!tpu.dma_semaphore, #tpu.memory_space<semaphore_mem>>)
    %c0_i32_0 = arith.constant 0 : i32
    %2 = tpu.memref_slice %arg2[%c0_i32_0] : memref<1x!tpu.dma_semaphore, #tpu.memory_space<semaphore_mem>> -> memref<1x!tpu.dma_semaphore, #tpu.memory_space<semaphore_mem>>
    %3 = tpu.memref_squeeze %2 : memref<1x!tpu.dma_semaphore, #tpu.memory_space<semaphore_mem>> -> memref<!tpu.dma_semaphore, #tpu.memory_space<semaphore_mem>>
    tpu.wait_dma2 semaphore(%3 : memref<!tpu.dma_semaphore, #tpu.memory_space<semaphore_mem>>) src(%arg0 : memref<2x4x16x16xf32, #tpu.memory_space<any>>) dst(%arg1 : memref<2x4x16x16xf32, #tpu.memory_space<any>>)
    return
  }
}

</mosaic_0001>

<bundles_post_ra>
// kernel: tpu_custom_call.1
= control target key start
LH: loop header
LB: loop body
LE: loop exit
PB: predicated region body
PF: predicated region fallthrough
CT: control target
= control target key end

     0   :  { %s30_s6 = smov [#allocation2]   ;;  %s31_s7 = smov 131072   ;;  %s49_s0 = inlined_call_operand.hbm [shape: f32[2,4,16,16], index: 0, kind: input, shape index: {}]   ;;  %s50_s1 = inlined_call_operand.hbm [shape: f32[2,4,16,16], index: 1, kind: output, shape index: {}]  }
   0x1   :  { %s32_s8 = smov 0  }
   0x2   :  { %12 = dma.general %s49_s0, 2048, %s50_s1, %s30_s6, %s31_s7, [#allocation4], %s32_s8, 0  }
   0x3   :  { %28 = dma.done.wait [#allocation2], 2048 }
   0x4   :  { %29 = vsyncadd [#allocation2], 4294965248 }
   0x5   :  { %18 = vsyncmov [#allocation2] }
   0x8   :  { %s19_s13 = vpop.sfrf %18 }
   0x9   :  { %p24_p0 = scmp.ne.s32.totalorder %s19_s13, 0 }
   0xb   :  { %23 = shalt.err (%p24_p0)  }

</bundles_post_ra>
